<compile_context>
chip_gen: v5e
topology: v5e:2x2
jax: 0.10.0
libtpu: 0.0.40
codegen_flags: <defaults>
</compile_context>

<pallas_src>
import jax
import jax.numpy as jnp
from jax.experimental import pallas as pl
from jax.experimental.pallas import tpu as pltpu

IN_F = 128      # state vector size (nn.Linear(128, 256))
HID = 256       # hidden width
OUT_F = 9       # number of actions (nn.Linear(256, 9))
OUT_PAD = 128   # lane-dense padded output width
TILE_B = 128    # batch rows per grid step (fills MXU rows on v5e/v6e/v7x)


def qnet_kernel(x_ref, w1_ref, b1_ref, w2_ref, b2_ref, o_ref):
    # fc1: (TB,128)bf16 @ (128,256)bf16 -> fp32 acc, + bias, relu
    h = jnp.dot(x_ref[...], w1_ref[...], preferred_element_type=jnp.float32)
    h = jnp.maximum(h + b1_ref[...], 0.0)
    # fc2 (lane-padded): (TB,256)bf16 @ (256,128)bf16 -> fp32 acc, + bias
    out = jnp.dot(h.astype(w2_ref.dtype), w2_ref[...],
                  preferred_element_type=jnp.float32)
    o_ref[...] = (out + b2_ref[...]).astype(o_ref.dtype)


@jax.jit
def q_network_forward(x, w1, b1, w2, b2):
    """x: (B, 128) float32.  Weights stored (in_features, out_features).
    Returns (B, 9) float32 Q-values (matches PyTorch Q_Network.forward)."""
    B = x.shape[0]
    n_tiles = pl.cdiv(B, TILE_B)
    B_pad = n_tiles * TILE_B

    # bf16 inputs/weights; fp32 accumulation happens inside the kernel.
    x_p = jnp.zeros((B_pad, IN_F), jnp.bfloat16).at[:B].set(
        x.astype(jnp.bfloat16))
    w1_b = w1.astype(jnp.bfloat16)
    # Lane-dense second layer: pad 9 -> 128 output columns with zeros.
    w2_b = jnp.zeros((HID, OUT_PAD), jnp.bfloat16).at[:, :OUT_F].set(
        w2.astype(jnp.bfloat16))
    b1_f = b1.reshape(1, HID).astype(jnp.float32)
    b2_f = jnp.zeros((1, OUT_PAD), jnp.float32).at[:, :OUT_F].set(
        b2.reshape(1, OUT_F).astype(jnp.float32))

    flops = 2 * B_pad * (IN_F * HID + HID * OUT_PAD)
    bytes_accessed = (x_p.size * 2 + w1_b.size * 2 + w2_b.size * 2
                      + b1_f.size * 4 + b2_f.size * 4 + B_pad * OUT_PAD * 4)

    out = pl.pallas_call(
        qnet_kernel,
        out_shape=jax.ShapeDtypeStruct((B_pad, OUT_PAD), jnp.float32),
        grid=(n_tiles,),
        in_specs=[
            pl.BlockSpec((TILE_B, IN_F), lambda i: (i, 0)),   # x tile
            pl.BlockSpec((IN_F, HID), lambda i: (0, 0)),      # w1 (resident)
            pl.BlockSpec((1, HID), lambda i: (0, 0)),         # b1 (resident)
            pl.BlockSpec((HID, OUT_PAD), lambda i: (0, 0)),   # w2 (resident)
            pl.BlockSpec((1, OUT_PAD), lambda i: (0, 0)),     # b2 (resident)
        ],
        out_specs=pl.BlockSpec((TILE_B, OUT_PAD), lambda i: (i, 0)),
        compiler_params=pltpu.CompilerParams(
            dimension_semantics=("parallel",)),
        cost_estimate=pl.CostEstimate(flops=flops, transcendentals=0,
                                      bytes_accessed=bytes_accessed),
    )(x_p, w1_b, b1_f, w2_b, b2_f)

    return out[:B, :OUT_F]


def init_params(key):
    """Deterministic init matching PyTorch nn.Linear default:
    uniform(-1/sqrt(fan_in), 1/sqrt(fan_in)) for weight and bias.
    Weights are stored as (in_features, out_features)."""
    k1, k2, k3, k4 = jax.random.split(key, 4)
    bound1 = 1.0 / jnp.sqrt(float(IN_F))
    bound2 = 1.0 / jnp.sqrt(float(HID))
    w1 = jax.random.uniform(k1, (IN_F, HID), jnp.float32, -bound1, bound1)
    b1 = jax.random.uniform(k2, (1, HID), jnp.float32, -bound1, bound1)
    w2 = jax.random.uniform(k3, (HID, OUT_F), jnp.float32, -bound2, bound2)
    b2 = jax.random.uniform(k4, (1, OUT_F), jnp.float32, -bound2, bound2)
    return w1, b1, w2, b2


def reference_forward(x, w1, b1, w2, b2):
    h = jnp.maximum(x @ w1 + b1, 0.0)
    return h @ w2 + b2


# TODO(synk): sampling_action (epsilon-greedy with host RNG) is control flow
# around the forward pass and is intentionally not implemented as a kernel.

if __name__ == "__main__":
    key = jax.random.PRNGKey(0)
    kx, kp = jax.random.split(key)

    B = 8  # small batch of game states, each a 128-dim state vector
    x = jax.random.normal(kx, (B, IN_F), jnp.float32)
    w1, b1, w2, b2 = init_params(kp)

    out = q_network_forward(x, w1, b1, w2, b2)
    out = jax.block_until_ready(out)

    ref = reference_forward(x, w1, b1, w2, b2)
    assert out.shape == (B, OUT_F)
    # bf16 inputs / fp32 accumulation vs. a pure fp32 reference.
    assert jnp.allclose(out, ref, atol=3e-2, rtol=3e-2)

    print("KERNEL_OK")
</pallas_src>

<mosaic_0001>
module attributes {stable_mosaic.version = 11 : i64} {
  func.func @qnet_kernel(%arg0: i32, %arg1: memref<128x128xbf16, #tpu.memory_space<vmem>>, %arg2: memref<128x256xbf16, #tpu.memory_space<vmem>>, %arg3: memref<1x256xf32, #tpu.memory_space<vmem>>, %arg4: memref<256x128xbf16, #tpu.memory_space<vmem>>, %arg5: memref<1x128xf32, #tpu.memory_space<vmem>>, %arg6: memref<128x128xf32, #tpu.memory_space<vmem>>) attributes {dimension_semantics = [#tpu.dimension_semantics<parallel>], iteration_bounds = array<i64: 1>, scalar_prefetch = 0 : i64, scratch_operands = 0 : i64, tpu.core_type = #tpu.core_type<tc>, window_params = [{transform_indices = @transform_0, window_bounds = array<i64: 128, 128>}, {pipeline_mode = #tpu.pipeline_mode<synchronous>, transform_indices = @transform_1, window_bounds = array<i64: 128, 256>}, {pipeline_mode = #tpu.pipeline_mode<synchronous>, transform_indices = @transform_2, window_bounds = array<i64: 1, 256>}, {pipeline_mode = #tpu.pipeline_mode<synchronous>, transform_indices = @transform_3, window_bounds = array<i64: 256, 128>}, {pipeline_mode = #tpu.pipeline_mode<synchronous>, transform_indices = @transform_4, window_bounds = array<i64: 1, 128>}, {transform_indices = @transform_5, window_bounds = array<i64: 128, 128>}]} {
    %c0 = arith.constant 0 : index
    %c0_0 = arith.constant 0 : index
    %0 = vector.load %arg1[%c0, %c0_0] : memref<128x128xbf16, #tpu.memory_space<vmem>>, vector<128x128xbf16>
    %c0_1 = arith.constant 0 : index
    %c0_2 = arith.constant 0 : index
    %1 = vector.load %arg2[%c0_1, %c0_2] : memref<128x256xbf16, #tpu.memory_space<vmem>>, vector<128x256xbf16>
    %cst = arith.constant dense<0.000000e+00> : vector<128x256xf32>
    %2 = tpu.matmul %0, %1, %cst {dimension_numbers = #tpu.dot_dimension_numbers<[1], [0], [0], [1], [0, 0, 1, 1], [], []>} : vector<128x128xbf16>, vector<128x256xbf16>, vector<128x256xf32> -> vector<128x256xf32>
    %c0_3 = arith.constant 0 : index
    %c0_4 = arith.constant 0 : index
    %3 = vector.load %arg3[%c0_3, %c0_4] : memref<1x256xf32, #tpu.memory_space<vmem>>, vector<1x256xf32>
    %4 = vector.broadcast %3 : vector<1x256xf32> to vector<128x256xf32>
    %5 = arith.addf %2, %4 : vector<128x256xf32>
    %cst_5 = arith.constant 0.000000e+00 : f32
    %6 = vector.broadcast %cst_5 : f32 to vector<128x256xf32>
    %7 = arith.maximumf %5, %6 : vector<128x256xf32>
    %8 = arith.truncf %7 : vector<128x256xf32> to vector<128x256xbf16>
    %c0_6 = arith.constant 0 : index
    %c0_7 = arith.constant 0 : index
    %9 = vector.load %arg4[%c0_6, %c0_7] : memref<256x128xbf16, #tpu.memory_space<vmem>>, vector<256x128xbf16>
    %cst_8 = arith.constant dense<0.000000e+00> : vector<128x128xf32>
    %10 = tpu.matmul %8, %9, %cst_8 {dimension_numbers = #tpu.dot_dimension_numbers<[1], [0], [0], [1], [0, 0, 1, 1], [], []>} : vector<128x256xbf16>, vector<256x128xbf16>, vector<128x128xf32> -> vector<128x128xf32>
    %c0_9 = arith.constant 0 : index
    %c0_10 = arith.constant 0 : index
    %11 = vector.load %arg5[%c0_9, %c0_10] : memref<1x128xf32, #tpu.memory_space<vmem>>, vector<1x128xf32>
    %12 = vector.broadcast %11 : vector<1x128xf32> to vector<128x128xf32>
    %13 = arith.addf %10, %12 : vector<128x128xf32>
    %c0_11 = arith.constant 0 : index
    %c0_12 = arith.constant 0 : index
    %14 = vector.load %arg6[%c0_11, %c0_12] : memref<128x128xf32, #tpu.memory_space<vmem>>, vector<128x128xf32>
    tpu.vector_store %arg6[%c0_11, %c0_12], %13 {strides = array<i32>} : memref<128x128xf32, #tpu.memory_space<vmem>>, vector<128x128xf32>,
    return
  }
  func.func @transform_0(%arg0: i32) -> (i32, i32) {
    %c0_i32 = arith.constant 0 : i32
    %c0_i32_0 = arith.constant 0 : i32
    return %arg0, %c0_i32 : i32, i32
  }
  func.func @transform_1(%arg0: i32) -> (i32, i32) {
    %c0_i32 = arith.constant 0 : i32
    %c0_i32_0 = arith.constant 0 : i32
    %c0_i32_1 = arith.constant 0 : i32
    return %c0_i32, %c0_i32_0 : i32, i32
  }
  func.func @transform_2(%arg0: i32) -> (i32, i32) {
    %c0_i32 = arith.constant 0 : i32
    %c0_i32_0 = arith.constant 0 : i32
    %c0_i32_1 = arith.constant 0 : i32
    return %c0_i32, %c0_i32_0 : i32, i32
  }
  func.func @transform_3(%arg0: i32) -> (i32, i32) {
    %c0_i32 = arith.constant 0 : i32
    %c0_i32_0 = arith.constant 0 : i32
    %c0_i32_1 = arith.constant 0 : i32
    return %c0_i32, %c0_i32_0 : i32, i32
  }
  func.func @transform_4(%arg0: i32) -> (i32, i32) {
    %c0_i32 = arith.constant 0 : i32
    %c0_i32_0 = arith.constant 0 : i32
    %c0_i32_1 = arith.constant 0 : i32
    return %c0_i32, %c0_i32_0 : i32, i32
  }
  func.func @transform_5(%arg0: i32) -> (i32, i32) {
    %c0_i32 = arith.constant 0 : i32
    %c0_i32_0 = arith.constant 0 : i32
    return %arg0, %c0_i32 : i32, i32
  }
}

</mosaic_0001>

<bundles_post_ra>
// kernel: q_network_forward.1
= control target key start
LH: loop header
LB: loop body
LE: loop exit
PB: predicated region body
PF: predicated region fallthrough
CT: control target
= control target key end

     0   :  { %s1089_s1 = inlined_call_operand.vmem [shape: bf16[128,256], index: 1, kind: input, shape index: {}]   ;;  %s1090_s0 = inlined_call_operand.vmem [shape: bf16[128,128], index: 0, kind: input, shape index: {}]   ;;  %s1091_s3 = inlined_call_operand.vmem [shape: bf16[256,128], index: 3, kind: input, shape index: {}]   ;;  %s1092_s2 = inlined_call_operand.vmem [shape: f32[1,256], index: 2, kind: input, shape index: {}]   ;;  %s1093_s4 = inlined_call_operand.vmem [shape: f32[1,128], index: 4, kind: input, shape index: {}]   ;;  %s1094_s5 = inlined_call_operand.vmem [shape: f32[128,128], index: 5, kind: output, shape index: {}]  }
   0x1   :  { %v672_v0 = vld [vmem:[%s1089_s1 + $0x70] sm:$0xf]  ;;  %v765_v1 = vld [vmem:[%s1089_s1 + $0x74] sm:$0xf0]  ;;  %v764_v2 = vld [vmem:[%s1089_s1 + $0x74] sm:$0xf] }
   0x2   :  { %v673_v3 = vor.u32 %v765_v1, %v672_v0  ;;  %v674_v4 = vld [vmem:[%s1089_s1 + $0x78] sm:$0xf0]  ;;  %v664_v5 = vld [vmem:[%s1089_s1 + $0x60] sm:$0xf]  ;;  %v763_v6 = vld [vmem:[%s1089_s1 + $0x64] sm:$0xf0] }
   0x3   :  { %v677_v7 = vor.u32 %v764_v2, %v674_v4  ;;  %v762_v8 = vld [vmem:[%s1089_s1 + $0x64] sm:$0xf]  ;;  %v666_v9 = vld [vmem:[%s1089_s1 + $0x68] sm:$0xf0]  ;;  %v665_v10 = vor.u32 %v763_v6, %v664_v5  ;;  %v656_v12 = vld [vmem:[%s1089_s1 + $0x50] sm:$0xf] }
   0x4   :  { %186 = vmatpush.bf16.msra.mxu0 %v673_v3  ;;  %v669_v11 = vor.u32 %v762_v8, %v666_v9  ;;  %v761_v13 = vld [vmem:[%s1089_s1 + $0x54] sm:$0xf0]  ;;  %v760_v14 = vld [vmem:[%s1089_s1 + $0x54] sm:$0xf]  ;;  %v658_v15 = vld [vmem:[%s1089_s1 + $0x58] sm:$0xf0] }
   0x5   :  { %235 = vmatpush.bf16.msra.mxu1 %v677_v7  ;;  %v657_v16 = vor.u32 %v761_v13, %v656_v12  ;;  %v661_v17 = vor.u32 %v760_v14, %v658_v15  ;;  %v648_v18 = vld [vmem:[%s1089_s1 + $0x40] sm:$0xf]  ;;  %v759_v19 = vld [vmem:[%s1089_s1 + $0x44] sm:$0xf0]  ;;  %v758_v20 = vld [vmem:[%s1089_s1 + $0x44] sm:$0xf] }
   0x6   :  { %v650_v21 = vld [vmem:[%s1089_s1 + $0x48] sm:$0xf0]  ;;  %v649_v22 = vor.u32 %v759_v19, %v648_v18  ;;  %v640_v24 = vld [vmem:[%s1089_s1 + $0x30] sm:$0xf]  ;;  %v757_v25 = vld [vmem:[%s1089_s1 + $0x34] sm:$0xf0] }
   0x7   :  { %v653_v23 = vor.u32 %v758_v20, %v650_v21  ;;  %v756_v26 = vld [vmem:[%s1089_s1 + $0x34] sm:$0xf]  ;;  %v642_v27 = vld [vmem:[%s1089_s1 + $0x38] sm:$0xf0]  ;;  %v641_v28 = vor.u32 %v757_v25, %v640_v24  ;;  %v632_v30 = vld [vmem:[%s1089_s1 + $0x20] sm:$0xf] }
   0x8   :  { %187 = vmatpush.bf16.msra.mxu0 %v665_v10  ;;  %v645_v29 = vor.u32 %v756_v26, %v642_v27  ;;  %v755_v31 = vld [vmem:[%s1089_s1 + $0x24] sm:$0xf0]  ;;  %v754_v32 = vld [vmem:[%s1089_s1 + $0x24] sm:$0xf]  ;;  %v634_v33 = vld [vmem:[%s1089_s1 + $0x28] sm:$0xf0] }
   0x9   :  { %236 = vmatpush.bf16.msra.mxu1 %v669_v11  ;;  %v633_v34 = vor.u32 %v755_v31, %v632_v30  ;;  %v637_v35 = vor.u32 %v754_v32, %v634_v33  ;;  %v624_v36 = vld [vmem:[%s1089_s1 + $0x10] sm:$0xf]  ;;  %v753_v37 = vld [vmem:[%s1089_s1 + $0x14] sm:$0xf0]  ;;  %v752_v38 = vld [vmem:[%s1089_s1 + $0x14] sm:$0xf] }
   0xa   :  { %v626_v39 = vld [vmem:[%s1089_s1 + $0x18] sm:$0xf0]  ;;  %v625_v40 = vor.u32 %v753_v37, %v624_v36  ;;  %v616_v42 = vld [vmem:[%s1089_s1] sm:$0xf]  ;;  %v751_v43 = vld [vmem:[%s1089_s1 + $0x4] sm:$0xf0] }
   0xb   :  { %v629_v41 = vor.u32 %v752_v38, %v626_v39  ;;  %v750_v44 = vld [vmem:[%s1089_s1 + $0x4] sm:$0xf]  ;;  %v618_v45 = vld [vmem:[%s1089_s1 + $0x8] sm:$0xf0]  ;;  %v617_v46 = vor.u32 %v751_v43, %v616_v42  ;;  %v744_v50 = vld [vmem:[%s1090_s0 + $0x10] sm:$0xff] }
   0xc   :  { %188 = vmatpush.bf16.msra.mxu0 %v657_v16  ;;  %v621_v47 = vor.u32 %v750_v44, %v618_v45  ;;  %v742_v48 = vld [vmem:[%s1090_s0] sm:$0xff]  ;;  %v743_v49 = vld [vmem:[%s1090_s0 + $0x8] sm:$0xff]  ;;  %v745_v51 = vld [vmem:[%s1090_s0 + $0x18] sm:$0xff] }
   0xd   :  { %237 = vmatpush.bf16.msra.mxu1 %v661_v17  ;;  %v746_v52 = vld [vmem:[%s1090_s0 + $0x20] sm:$0xff]  ;;  %v773_v53 = vld [vmem:[%s1091_s3 + $0x38] sm:$0xff]  ;;  %v747_v55 = vld [vmem:[%s1090_s0 + $0x28] sm:$0xff] }
   0xe   :  { %v781_v54 = vld [vmem:[%s1091_s3 + $0x78] sm:$0xff]  ;;  %464 = vmatpush.bf16.msra.mxu2 %v773_v53  ;;  %v772_v56 = vld [vmem:[%s1091_s3 + $0x30] sm:$0xff]  ;;  %v771_v58 = vld [vmem:[%s1091_s3 + $0x28] sm:$0xff] }
   0xf   :  { %513 = vmatpush.bf16.msra.mxu3 %v781_v54  ;;  %v780_v57 = vld [vmem:[%s1091_s3 + $0x70] sm:$0xff]  ;;  %v779_v59 = vld [vmem:[%s1091_s3 + $0x68] sm:$0xff]  ;;  %v770_v60 = vld [vmem:[%s1091_s3 + $0x20] sm:$0xff] }
  0x10   :  { %189 = vmatpush.bf16.msra.mxu0 %v649_v22  ;;  %v778_v61 = vld [vmem:[%s1091_s3 + $0x60] sm:$0xff]  ;;  %v748_v62 = vld [vmem:[%s1090_s0 + $0x30] sm:$0xff]  ;;  %v769_v63 = vld [vmem:[%s1091_s3 + $0x18] sm:$0xff] }
  0x11   :  { %238 = vmatpush.bf16.msra.mxu1 %v653_v23  ;;  %v777_v0 = vld [vmem:[%s1091_s3 + $0x58] sm:$0xff]  ;;  %v768_v1 = vld [vmem:[%s1091_s3 + $0x10] sm:$0xff]  ;;  %v767_v3 = vld [vmem:[%s1091_s3 + $0x8] sm:$0xff] }
  0x12   :  { %465 = vmatpush.bf16.msra.mxu2 %v772_v56  ;;  %v776_v2 = vld [vmem:[%s1091_s3 + $0x50] sm:$0xff]  ;;  %v775_v4 = vld [vmem:[%s1091_s3 + $0x48] sm:$0xff]  ;;  %v766_v5 = vld [vmem:[%s1091_s3] sm:$0xff] }
  0x13   :  { %514 = vmatpush.bf16.msra.mxu3 %v780_v57  ;;  %v774_v6 = vld [vmem:[%s1091_s3 + $0x40] sm:$0xff]  ;;  %v749_v7 = vld [vmem:[%s1090_s0 + $0x38] sm:$0xff] }
  0x14   :  { %190 = vmatpush.bf16.msra.mxu0 %v641_v28  ;;  %v52_v8 = vld [vmem:[%s1092_s2] sm:$0x3] }
  0x15   :  { %239 = vmatpush.bf16.msra.mxu1 %v645_v29  ;;  %v984_v11 = vperm.slane %v52_v8, 0  ;;  %v986_v12 = vperm.slane %v52_v8, 1 }
  0x16   :  { %466 = vmatpush.bf16.msra.mxu2 %v771_v58 }
  0x17   :  { %515 = vmatpush.bf16.msra.mxu3 %v779_v59 }
  0x18   :  { %191 = vmatpush.bf16.msra.mxu0 %v633_v34 }
  0x19   :  { %240 = vmatpush.bf16.msra.mxu1 %v637_v35 }
  0x1a   :  { %467 = vmatpush.bf16.msra.mxu2 %v770_v60 }
  0x1b   :  { %516 = vmatpush.bf16.msra.mxu3 %v778_v61 }
  0x1c   :  { %192 = vmatpush.bf16.msra.mxu0 %v625_v40 }
  0x1d   :  { %241 = vmatpush.bf16.msra.mxu1 %v629_v41 }
  0x1e   :  { %468 = vmatpush.bf16.msra.mxu2 %v769_v63 }
  0x1f   :  { %517 = vmatpush.bf16.msra.mxu3 %v777_v0 }
  0x20   :  { %193 = vmatpush.bf16.msra.mxu0 %v617_v46 }
  0x21   :  { %242 = vmatpush.bf16.msra.mxu1 %v621_v47 }
  0x22   :  { %469 = vmatpush.bf16.msra.mxu2 %v768_v1 }
  0x23   :  { %194 = vmatmul.bf16.vlgmr.msra.gmra.mxu0 %v742_v48  ;;  %518 = vmatpush.bf16.msra.mxu3 %v776_v2 }
  0x24   :  { %243 = vmatmul.bf16.vlgmr.msra.gmra.mxu1 %v742_v48 }
  0x26   :  { %470 = vmatpush.bf16.msra.mxu2 %v767_v3 }
  0x27   :  { %519 = vmatpush.bf16.msra.mxu3 %v775_v4 }
  0x2a   :  { %471 = vmatpush.bf16.msra.mxu2 %v766_v5 }
  0x2b   :  { %520 = vmatpush.bf16.msra.mxu3 %v774_v6 }
  0x33   :  { %199 = vmatmul.bf16.gmra.mxu0 %v743_v49 }
  0x34   :  { %248 = vmatmul.bf16.gmra.mxu1 %v743_v49 }
  0x43   :  { %204 = vmatmul.bf16.gmra.mxu0 %v744_v50 }
  0x44   :  { %253 = vmatmul.bf16.gmra.mxu1 %v744_v50 }
  0x53   :  { %209 = vmatmul.bf16.gmra.mxu0 %v745_v51 }
  0x54   :  { %258 = vmatmul.bf16.gmra.mxu1 %v745_v51 }
  0x63   :  { %214 = vmatmul.bf16.gmra.mxu0 %v746_v52 }
  0x64   :  { %263 = vmatmul.bf16.gmra.mxu1 %v746_v52 }
  0x73   :  { %219 = vmatmul.bf16.gmra.mxu0 %v747_v55 }
  0x74   :  { %268 = vmatmul.bf16.gmra.mxu1 %v747_v55 }
  0x83   :  { %224 = vmatmul.bf16.gmra.mxu0 %v748_v62 }
  0x84   :  { %273 = vmatmul.bf16.gmra.mxu1 %v748_v62 }
  0x93   :  { %229 = vmatmul.bf16.gmra.mxu0 %v749_v7 }
  0x94   :  { %278 = vmatmul.bf16.gmra.mxu1 %v749_v7 }
  0xa0   :  { %v195_v9 = vpop.f32.mrf.mxu0 }
  0xa1   :  { %v244_v10 = vpop.f32.mrf.mxu1  ;;  %v196_v13 = vadd.f32 %v195_v9, %v984_v11 }
  0xa2   :  { %v245_v14 = vadd.f32 %v244_v10, %v986_v12 }
  0xa3   :  { %v284_v19 = vmax.f32 %v196_v13, 0.0 }
  0xa4   :  { %v285_v21 = vmax.f32 %v245_v14, 0.0 }
  0xa8   :  { %v197_v15 = vpop.f32.mrf.mxu0 }
  0xa9   :  { %v198_v16 = vadd.f32 %v197_v15, %v984_v11  ;;  %v246_v17 = vpop.f32.mrf.mxu1 }
  0xaa   :  { %v247_v18 = vadd.f32 %v246_v17, %v986_v12 }
  0xab   :  { %v286_v20 = vmax.f32 %v198_v16, 0.0 }
  0xac   :  { %v287_v22 = vmax.f32 %v247_v18, 0.0 }
  0xad   :  { %v316_v23 = vpack.c.bf16 %v286_v20, %v284_v19 }
  0xae   :  { %v317_v24 = vpack.c.bf16 %v287_v22, %v285_v21 }
  0xaf   :  { %472 = vmatmul.bf16.vlgmr.msra.gmra.mxu2 %v316_v23 }
  0xb0   :  { %521 = vmatmul.bf16.vlgmr.msra.gmra.mxu3 %v317_v24  ;;  %v200_v25 = vpop.f32.mrf.mxu0 }
  0xb1   :  { %v249_v26 = vpop.f32.mrf.mxu1  ;;  %v201_v27 = vadd.f32 %v200_v25, %v984_v11 }
  0xb2   :  { %v250_v28 = vadd.f32 %v249_v26, %v986_v12 }
  0xb3   :  { %v288_v33 = vmax.f32 %v201_v27, 0.0 }
  0xb4   :  { %v289_v35 = vmax.f32 %v250_v28, 0.0 }
  0xb8   :  { %v202_v29 = vpop.f32.mrf.mxu0 }
  0xb9   :  { %v203_v30 = vadd.f32 %v202_v29, %v984_v11  ;;  %v251_v31 = vpop.f32.mrf.mxu1 }
  0xba   :  { %v252_v32 = vadd.f32 %v251_v31, %v986_v12 }
  0xbb   :  { %v290_v34 = vmax.f32 %v203_v30, 0.0 }
  0xbc   :  { %v291_v36 = vmax.f32 %v252_v32, 0.0 }
  0xbd   :  { %v318_v37 = vpack.c.bf16 %v290_v34, %v288_v33 }
  0xbe   :  { %v319_v38 = vpack.c.bf16 %v291_v36, %v289_v35 }
  0xbf   :  { %477 = vmatmul.bf16.gmra.mxu2 %v318_v37 }
  0xc0   :  { %526 = vmatmul.bf16.gmra.mxu3 %v319_v38  ;;  %v205_v39 = vpop.f32.mrf.mxu0 }
  0xc1   :  { %v254_v40 = vpop.f32.mrf.mxu1  ;;  %v206_v41 = vadd.f32 %v205_v39, %v984_v11 }
  0xc2   :  { %v255_v42 = vadd.f32 %v254_v40, %v986_v12 }
  0xc3   :  { %v292_v47 = vmax.f32 %v206_v41, 0.0 }
  0xc4   :  { %v293_v49 = vmax.f32 %v255_v42, 0.0 }
  0xc8   :  { %v207_v43 = vpop.f32.mrf.mxu0 }
  0xc9   :  { %v208_v44 = vadd.f32 %v207_v43, %v984_v11  ;;  %v256_v45 = vpop.f32.mrf.mxu1 }
  0xca   :  { %v257_v46 = vadd.f32 %v256_v45, %v986_v12 }
  0xcb   :  { %v294_v48 = vmax.f32 %v208_v44, 0.0 }
  0xcc   :  { %v295_v50 = vmax.f32 %v257_v46, 0.0 }
  0xcd   :  { %v320_v51 = vpack.c.bf16 %v294_v48, %v292_v47 }
  0xce   :  { %v321_v52 = vpack.c.bf16 %v295_v50, %v293_v49 }
  0xcf   :  { %482 = vmatmul.bf16.gmra.mxu2 %v320_v51 }
  0xd0   :  { %531 = vmatmul.bf16.gmra.mxu3 %v321_v52  ;;  %v210_v53 = vpop.f32.mrf.mxu0 }
  0xd1   :  { %v259_v54 = vpop.f32.mrf.mxu1  ;;  %v211_v55 = vadd.f32 %v210_v53, %v984_v11 }
  0xd2   :  { %v260_v56 = vadd.f32 %v259_v54, %v986_v12 }
  0xd3   :  { %v296_v61 = vmax.f32 %v211_v55, 0.0 }
  0xd4   :  { %v297_v63 = vmax.f32 %v260_v56, 0.0 }
  0xd8   :  { %v212_v57 = vpop.f32.mrf.mxu0 }
  0xd9   :  { %v213_v58 = vadd.f32 %v212_v57, %v984_v11  ;;  %v261_v59 = vpop.f32.mrf.mxu1 }
  0xda   :  { %v262_v60 = vadd.f32 %v261_v59, %v986_v12 }
  0xdb   :  { %v298_v62 = vmax.f32 %v213_v58, 0.0 }
  0xdc   :  { %v299_v0 = vmax.f32 %v262_v60, 0.0 }
  0xdd   :  { %v322_v1 = vpack.c.bf16 %v298_v62, %v296_v61  ;;  %v1023_v61 = vld [vmem:[%s1093_s4] ss:$0 sm:$0xff] }
  0xde   :  { %v323_v2 = vpack.c.bf16 %v299_v0, %v297_v63 }
  0xdf   :  { %487 = vmatmul.bf16.gmra.mxu2 %v322_v1 }
  0xe0   :  { %536 = vmatmul.bf16.gmra.mxu3 %v323_v2  ;;  %v215_v3 = vpop.f32.mrf.mxu0 }
  0xe1   :  { %v264_v4 = vpop.f32.mrf.mxu1  ;;  %v216_v5 = vadd.f32 %v215_v3, %v984_v11 }
  0xe2   :  { %v265_v6 = vadd.f32 %v264_v4, %v986_v12 }
  0xe3   :  { %v300_v13 = vmax.f32 %v216_v5, 0.0 }
  0xe4   :  { %v301_v15 = vmax.f32 %v265_v6, 0.0 }
  0xe8   :  { %v217_v7 = vpop.f32.mrf.mxu0 }
  0xe9   :  { %v218_v8 = vadd.f32 %v217_v7, %v984_v11  ;;  %v266_v9 = vpop.f32.mrf.mxu1 }
  0xea   :  { %v267_v10 = vadd.f32 %v266_v9, %v986_v12 }
  0xeb   :  { %v302_v14 = vmax.f32 %v218_v8, 0.0 }
  0xec   :  { %v303_v16 = vmax.f32 %v267_v10, 0.0 }
  0xed   :  { %v324_v17 = vpack.c.bf16 %v302_v14, %v300_v13 }
  0xee   :  { %v325_v18 = vpack.c.bf16 %v303_v16, %v301_v15 }
  0xef   :  { %492 = vmatmul.bf16.gmra.mxu2 %v324_v17 }
  0xf0   :  { %541 = vmatmul.bf16.gmra.mxu3 %v325_v18  ;;  %v220_v19 = vpop.f32.mrf.mxu0 }
  0xf1   :  { %v269_v20 = vpop.f32.mrf.mxu1  ;;  %v221_v21 = vadd.f32 %v220_v19, %v984_v11 }
  0xf2   :  { %v270_v22 = vadd.f32 %v269_v20, %v986_v12 }
  0xf3   :  { %v304_v27 = vmax.f32 %v221_v21, 0.0 }
  0xf4   :  { %v305_v29 = vmax.f32 %v270_v22, 0.0 }
  0xf8   :  { %v222_v23 = vpop.f32.mrf.mxu0 }
  0xf9   :  { %v223_v24 = vadd.f32 %v222_v23, %v984_v11  ;;  %v271_v25 = vpop.f32.mrf.mxu1 }
  0xfa   :  { %v272_v26 = vadd.f32 %v271_v25, %v986_v12 }
  0xfb   :  { %v306_v28 = vmax.f32 %v223_v24, 0.0 }
  0xfc   :  { %v307_v30 = vmax.f32 %v272_v26, 0.0 }
  0xfd   :  { %v326_v31 = vpack.c.bf16 %v306_v28, %v304_v27 }
  0xfe   :  { %v327_v32 = vpack.c.bf16 %v307_v30, %v305_v29 }
  0xff   :  { %497 = vmatmul.bf16.gmra.mxu2 %v326_v31 }
 0x100   :  { %546 = vmatmul.bf16.gmra.mxu3 %v327_v32  ;;  %v225_v33 = vpop.f32.mrf.mxu0 }
 0x101   :  { %v274_v34 = vpop.f32.mrf.mxu1  ;;  %v226_v35 = vadd.f32 %v225_v33, %v984_v11 }
 0x102   :  { %v275_v36 = vadd.f32 %v274_v34, %v986_v12 }
 0x103   :  { %v308_v41 = vmax.f32 %v226_v35, 0.0 }
 0x104   :  { %v309_v43 = vmax.f32 %v275_v36, 0.0 }
 0x108   :  { %v227_v37 = vpop.f32.mrf.mxu0 }
 0x109   :  { %v228_v38 = vadd.f32 %v227_v37, %v984_v11  ;;  %v276_v39 = vpop.f32.mrf.mxu1 }
 0x10a   :  { %v277_v40 = vadd.f32 %v276_v39, %v986_v12 }
 0x10b   :  { %v310_v42 = vmax.f32 %v228_v38, 0.0 }
 0x10c   :  { %v311_v44 = vmax.f32 %v277_v40, 0.0 }
 0x10d   :  { %v328_v45 = vpack.c.bf16 %v310_v42, %v308_v41 }
 0x10e   :  { %v329_v46 = vpack.c.bf16 %v311_v44, %v309_v43 }
 0x10f   :  { %502 = vmatmul.bf16.gmra.mxu2 %v328_v45 }
 0x110   :  { %551 = vmatmul.bf16.gmra.mxu3 %v329_v46  ;;  %v230_v47 = vpop.f32.mrf.mxu0 }
 0x111   :  { %v279_v48 = vpop.f32.mrf.mxu1  ;;  %v231_v49 = vadd.f32 %v230_v47, %v984_v11 }
 0x112   :  { %v280_v50 = vadd.f32 %v279_v48, %v986_v12 }
 0x113   :  { %v312_v55 = vmax.f32 %v231_v49, 0.0 }
 0x114   :  { %v313_v57 = vmax.f32 %v280_v50, 0.0 }
 0x118   :  { %v232_v51 = vpop.f32.mrf.mxu0 }
 0x119   :  { %v233_v52 = vadd.f32 %v232_v51, %v984_v11  ;;  %v281_v53 = vpop.f32.mrf.mxu1 }
 0x11a   :  { %v282_v54 = vadd.f32 %v281_v53, %v986_v12 }
 0x11b   :  { %v314_v56 = vmax.f32 %v233_v52, 0.0 }
 0x11c   :  { %v315_v58 = vmax.f32 %v282_v54, 0.0 }
 0x11d   :  { %v330_v59 = vpack.c.bf16 %v314_v56, %v312_v55 }
 0x11e   :  { %v331_v60 = vpack.c.bf16 %v315_v58, %v313_v57 }
 0x11f   :  { %507 = vmatmul.bf16.gmra.mxu2 %v330_v59 }
 0x120   :  { %556 = vmatmul.bf16.gmra.mxu3 %v331_v60 }
 0x132   :  { %v473_v62 = vpop.f32.mrf.mxu2 }
 0x133   :  { %v474_v63 = vadd.f32 %v1023_v61, %v473_v62  ;;  %v522_v11 = vpop.f32.mrf.mxu3 }
 0x135   :  { %v523_v0 = vadd.f32 %v522_v11, %v474_v63 }
 0x137   :  { %562 = vst [vmem:[%s1094_s5] sm:$0xff] %v523_v0 }
 0x13a   :  { %v475_v12 = vpop.f32.mrf.mxu2 }
 0x13b   :  { %v476_v1 = vadd.f32 %v1023_v61, %v475_v12  ;;  %v524_v2 = vpop.f32.mrf.mxu3 }
 0x13d   :  { %v525_v3 = vadd.f32 %v524_v2, %v476_v1 }
 0x13f   :  { %563 = vst [vmem:[%s1094_s5 + $0x8] sm:$0xff] %v525_v3 }
 0x142   :  { %v478_v4 = vpop.f32.mrf.mxu2 }
 0x143   :  { %v479_v5 = vadd.f32 %v1023_v61, %v478_v4  ;;  %v527_v6 = vpop.f32.mrf.mxu3 }
 0x145   :  { %v528_v7 = vadd.f32 %v527_v6, %v479_v5 }
 0x147   :  { %564 = vst [vmem:[%s1094_s5 + $0x10] sm:$0xff] %v528_v7 }
 0x14a   :  { %v480_v8 = vpop.f32.mrf.mxu2 }
 0x14b   :  { %v481_v9 = vadd.f32 %v1023_v61, %v480_v8  ;;  %v529_v10 = vpop.f32.mrf.mxu3 }
 0x14d   :  { %v530_v13 = vadd.f32 %v529_v10, %v481_v9 }
 0x14f   :  { %565 = vst [vmem:[%s1094_s5 + $0x18] sm:$0xff] %v530_v13 }
 0x152   :  { %v483_v14 = vpop.f32.mrf.mxu2 }
 0x153   :  { %v484_v15 = vadd.f32 %v1023_v61, %v483_v14  ;;  %v532_v16 = vpop.f32.mrf.mxu3 }
 0x155   :  { %v533_v17 = vadd.f32 %v532_v16, %v484_v15 }
 0x157   :  { %566 = vst [vmem:[%s1094_s5 + $0x20] sm:$0xff] %v533_v17 }
 0x15a   :  { %v485_v18 = vpop.f32.mrf.mxu2 }
 0x15b   :  { %v486_v19 = vadd.f32 %v1023_v61, %v485_v18  ;;  %v534_v20 = vpop.f32.mrf.mxu3 }
 0x15d   :  { %v535_v21 = vadd.f32 %v534_v20, %v486_v19 }
 0x15f   :  { %567 = vst [vmem:[%s1094_s5 + $0x28] sm:$0xff] %v535_v21 }
 0x162   :  { %v488_v22 = vpop.f32.mrf.mxu2 }
 0x163   :  { %v489_v23 = vadd.f32 %v1023_v61, %v488_v22  ;;  %v537_v24 = vpop.f32.mrf.mxu3 }
 0x165   :  { %v538_v25 = vadd.f32 %v537_v24, %v489_v23 }
 0x167   :  { %568 = vst [vmem:[%s1094_s5 + $0x30] sm:$0xff] %v538_v25 }
 0x16a   :  { %v490_v26 = vpop.f32.mrf.mxu2 }
 0x16b   :  { %v491_v27 = vadd.f32 %v1023_v61, %v490_v26  ;;  %v539_v28 = vpop.f32.mrf.mxu3 }
 0x16d   :  { %v540_v29 = vadd.f32 %v539_v28, %v491_v27 }
 0x16f   :  { %569 = vst [vmem:[%s1094_s5 + $0x38] sm:$0xff] %v540_v29 }
 0x172   :  { %v493_v30 = vpop.f32.mrf.mxu2 }
 0x173   :  { %v494_v31 = vadd.f32 %v1023_v61, %v493_v30  ;;  %v542_v32 = vpop.f32.mrf.mxu3 }
 0x175   :  { %v543_v33 = vadd.f32 %v542_v32, %v494_v31 }
 0x177   :  { %570 = vst [vmem:[%s1094_s5 + $0x40] sm:$0xff] %v543_v33 }
 0x17a   :  { %v495_v34 = vpop.f32.mrf.mxu2 }
 0x17b   :  { %v496_v35 = vadd.f32 %v1023_v61, %v495_v34  ;;  %v544_v36 = vpop.f32.mrf.mxu3 }
 0x17d   :  { %v545_v37 = vadd.f32 %v544_v36, %v496_v35 }
 0x17f   :  { %571 = vst [vmem:[%s1094_s5 + $0x48] sm:$0xff] %v545_v37 }
 0x182   :  { %v498_v38 = vpop.f32.mrf.mxu2 }
 0x183   :  { %v499_v39 = vadd.f32 %v1023_v61, %v498_v38  ;;  %v547_v40 = vpop.f32.mrf.mxu3 }
 0x185   :  { %v548_v41 = vadd.f32 %v547_v40, %v499_v39 }
 0x187   :  { %572 = vst [vmem:[%s1094_s5 + $0x50] sm:$0xff] %v548_v41 }
 0x18a   :  { %v500_v42 = vpop.f32.mrf.mxu2 }
 0x18b   :  { %v501_v43 = vadd.f32 %v1023_v61, %v500_v42  ;;  %v549_v44 = vpop.f32.mrf.mxu3 }
 0x18d   :  { %v550_v45 = vadd.f32 %v549_v44, %v501_v43 }
 0x18f   :  { %573 = vst [vmem:[%s1094_s5 + $0x58] sm:$0xff] %v550_v45 }
 0x192   :  { %v503_v46 = vpop.f32.mrf.mxu2 }
 0x193   :  { %v504_v47 = vadd.f32 %v1023_v61, %v503_v46  ;;  %v552_v48 = vpop.f32.mrf.mxu3 }
 0x195   :  { %v553_v49 = vadd.f32 %v552_v48, %v504_v47 }
 0x197   :  { %574 = vst [vmem:[%s1094_s5 + $0x60] sm:$0xff] %v553_v49 }
 0x19a   :  { %v505_v50 = vpop.f32.mrf.mxu2 }
 0x19b   :  { %v506_v51 = vadd.f32 %v1023_v61, %v505_v50  ;;  %v554_v52 = vpop.f32.mrf.mxu3 }
 0x19d   :  { %v555_v53 = vadd.f32 %v554_v52, %v506_v51 }
 0x19f   :  { %575 = vst [vmem:[%s1094_s5 + $0x68] sm:$0xff] %v555_v53 }
 0x1a2   :  { %v508_v54 = vpop.f32.mrf.mxu2 }
 0x1a3   :  { %v509_v55 = vadd.f32 %v1023_v61, %v508_v54  ;;  %v557_v56 = vpop.f32.mrf.mxu3 }
 0x1a5   :  { %v558_v57 = vadd.f32 %v557_v56, %v509_v55 }
 0x1a7   :  { %576 = vst [vmem:[%s1094_s5 + $0x70] sm:$0xff] %v558_v57 }
 0x1aa   :  { %v510_v58 = vpop.f32.mrf.mxu2 }
 0x1ab   :  { %v511_v59 = vadd.f32 %v1023_v61, %v510_v58  ;;  %v559_v60 = vpop.f32.mrf.mxu3 }
 0x1ad   :  { %v560_v62 = vadd.f32 %v559_v60, %v511_v59 }
 0x1af   :  { %577 = vst [vmem:[%s1094_s5 + $0x78] sm:$0xff] %v560_v62 }

</bundles_post_ra>
